<compile_context>
chip_gen: v7x
topology: tpu7x:2x2x1
jax: 0.10.0
libtpu: 0.0.40
codegen_flags: <defaults>
</compile_context>

<pallas_src>
import functools

import jax
import jax.numpy as jnp
from jax.experimental import pallas as pl
from jax.experimental.pallas import tpu as pltpu


_TILE_TARGET_BYTES = 2 * 1024 * 1024   # per tile buffer (~2-4 MiB HBM sweet spot)
_VMEM_LIMIT_BYTES = 32 * 1024 * 1024   # scoped VMEM limit; safe on v5e/v6e/v7x


# -----------------------------------------------------------------------------
# Kernels
# -----------------------------------------------------------------------------
def _rmsnorm_kernel(x_ref, w_ref, o_ref, *, eps):
    """Simple path: one logical row per kernel row (H on the lane axis)."""
    x = x_ref[...].astype(jnp.float32)              # keep accumulation in f32
    var = jnp.mean(x * x, axis=-1, keepdims=True)   # (tm, 1), XLU lane reduce
    inv = jax.lax.rsqrt(var + eps)                  # EUP (free bundle slot)
    o_ref[...] = (x * inv * w_ref[...]).astype(o_ref.dtype)


def _rmsnorm_packed_kernel(x_ref, seg_ref, segw_ref, o_ref, *, eps, inv_h):
    """Lane-dense path: k = 128 // H logical rows packed per 128-wide kernel row.

    seg_ref : (128, k) block-diagonal 0/1 matrix, seg[j, g] = (j // H == g)
    segw_ref: (k, 128) = seg.T * tiled_weight  (weight folded into broadcast-back)
    """
    x = x_ref[...].astype(jnp.float32)                                   # (tm, 128)
    seg_sum = jnp.dot(x * x, seg_ref[...],
                      preferred_element_type=jnp.float32)                # (tm, k)
    inv = jax.lax.rsqrt(seg_sum * inv_h + eps)                           # (tm, k)
    scale = jnp.dot(inv, segw_ref[...],
                    preferred_element_type=jnp.float32)                  # (tm, 128)
    o_ref[...] = (x * scale).astype(o_ref.dtype)


# -----------------------------------------------------------------------------
# Tiling policy
# -----------------------------------------------------------------------------
def _choose_row_tile(rows, width):
    """Byte-budgeted row tile; nudge the grid to an even step count (v7x balance)."""
    if rows <= 8:
        return rows
    tm = max(8, (_TILE_TARGET_BYTES // (width * 4) // 8) * 8)
    if tm >= rows:
        return rows                                    # single full-extent tile
    steps = -(-rows // tm)
    if steps > 2 and steps % 2 == 1:
        # Odd step counts leave one v7x TensorCore with an extra iteration.
        for cand_steps in (steps + 1, steps + 3):
            tm_c = max(8, ((-(-rows // cand_steps)) + 7) // 8 * 8)
            if (-(-rows // tm_c)) % 2 == 0:
                tm = tm_c
                break
    return tm


def _validate_row_tile(tm, rows):
    if tm <= 0 or tm > rows:
        raise ValueError(f"row_tile={tm} must be in [1, rows={rows}]")
    if tm != rows and tm % 8 != 0:
        raise ValueError(f"row_tile={tm} must be a multiple of 8 or equal rows={rows}")


def _pallas_rmsnorm_2d(kernel, inputs, in_specs, rows, width, tm, out_dtype):
    grid = (pl.cdiv(rows, tm),)   # padded tail tile is harmless (rows independent)
    return pl.pallas_call(
        kernel,
        out_shape=jax.ShapeDtypeStruct((rows, width), out_dtype),
        grid_spec=pltpu.PrefetchScalarGridSpec(
            num_scalar_prefetch=0,
            grid=grid,
            in_specs=in_specs,
            out_specs=pl.BlockSpec((tm, width), lambda i: (i, 0)),
        ),
        compiler_params=pltpu.CompilerParams(
            dimension_semantics=("parallel",),
            vmem_limit_bytes=_VMEM_LIMIT_BYTES,
        ),
    )(*inputs)


# -----------------------------------------------------------------------------
# Public wrapper
# -----------------------------------------------------------------------------
def mixed_fused_rmsnorm(x, weight, eps=1e-6, out_dtype=jnp.float32, row_tile=None):
    """x: (..., H) float, weight: (H,) float16 -> (..., H) out_dtype (default f32)."""
    orig_shape = x.shape
    H = orig_shape[-1]
    rows = 1
    for d in orig_shape[:-1]:
        rows *= d

    w32 = weight.astype(jnp.float32)   # one-time cast in XLA, not per grid step

    # --- lane-dense packed path for small hidden sizes -----------------------
    pack = 128 // H if (H < 128 and 128 % H == 0) else 1
    if pack > 1 and rows % pack == 0:
        rows_p = rows // pack
        width = pack * H                                          # == 128
        x2d = x.reshape(rows_p, width)
        lane = jnp.arange(width, dtype=jnp.int32)
        seg = (lane[:, None] // H ==
               jnp.arange(pack, dtype=jnp.int32)[None, :]).astype(jnp.float32)  # (128, k)
        segw = seg.T * jnp.tile(w32, (pack,))[None, :]            # (k, 128), weight folded
        tm = row_tile if row_tile is not None else _choose_row_tile(rows_p, width)
        _validate_row_tile(tm, rows_p)
        kernel = functools.partial(_rmsnorm_packed_kernel, eps=eps, inv_h=1.0 / H)
        in_specs = [
            pl.BlockSpec((tm, width), lambda i: (i, 0)),    # x tile (streamed)
            pl.BlockSpec((width, pack), lambda i: (0, 0)),  # segment matrix (resident)
            pl.BlockSpec((pack, width), lambda i: (0, 0)),  # seg.T * weight (resident)
        ]
        out2d = _pallas_rmsnorm_2d(kernel, (x2d, seg, segw), in_specs,
                                   rows_p, width, tm, out_dtype)
        return out2d.reshape(orig_shape)

    # --- simple path (H >= 128, or shapes the packing doesn't cover) ---------
    # TODO(synk): H < 128 with 128 % H != 0 (or rows % pack != 0) still hits
    # masked vst.msk partial stores; pad rows / generalize packing if those
    # shapes ever matter for performance.
    x2d = x.reshape(rows, H)
    w2d = w32.reshape(1, H)
    tm = row_tile if row_tile is not None else _choose_row_tile(rows, H)
    _validate_row_tile(tm, rows)
    kernel = functools.partial(_rmsnorm_kernel, eps=eps)
    in_specs = [
        pl.BlockSpec((tm, H), lambda i: (i, 0)),   # x tile (streamed)
        pl.BlockSpec((1, H), lambda i: (0, 0)),    # weight (resident, const idx)
    ]
    out2d = _pallas_rmsnorm_2d(kernel, (x2d, w2d), in_specs, rows, H, tm, out_dtype)
    return out2d.reshape(orig_shape)


# -----------------------------------------------------------------------------
# Reference + self-test
# -----------------------------------------------------------------------------
def _reference(x, weight, eps):
    var = jnp.mean(x * x, axis=-1, keepdims=True)
    return weight.astype(jnp.float32) * (x * jax.lax.rsqrt(var + eps))


if __name__ == "__main__":
    eps = 1e-6
    key = jax.random.PRNGKey(0)
    k1, k2, k3, k4 = jax.random.split(key, 4)

    hidden = 32
    weight = jnp.ones((hidden,), dtype=jnp.float16)  # nn.Parameter(torch.ones(H, fp16))

    # Case 1: (batch=2, seq=8, hidden=32) -> lane-dense packed path (k=4, grid=1).
    x1 = jax.random.normal(k1, (2, 8, hidden), dtype=jnp.float32)
    out1 = jax.block_until_ready(mixed_fused_rmsnorm(x1, weight, eps=eps))
    ref1 = _reference(x1, weight, eps)
    assert out1.shape == x1.shape and out1.dtype == jnp.float32
    assert jnp.allclose(out1, ref1, atol=1e-5, rtol=1e-5)

    # Case 2: rows=15 not divisible by the pack factor -> simple fallback path.
    x2 = jax.random.normal(k2, (3, 5, hidden), dtype=jnp.float32)
    out2 = jax.block_until_ready(mixed_fused_rmsnorm(x2, weight, eps=eps))
    ref2 = _reference(x2, weight, eps)
    assert out2.shape == x2.shape and out2.dtype == jnp.float32
    assert jnp.allclose(out2, ref2, atol=1e-5, rtol=1e-5)

    # Case 3: H=256 (already lane-dense), explicit row_tile=16 -> multi-step grid
    # with a padded tail block (rows=40 -> 3 steps), non-trivial weight.
    h3 = 256
    w3 = (0.5 + jnp.arange(h3, dtype=jnp.float32) / h3).astype(jnp.float16)
    x3 = jax.random.normal(k3, (5, 8, h3), dtype=jnp.float32)
    out3 = jax.block_until_ready(mixed_fused_rmsnorm(x3, w3, eps=eps, row_tile=16))
    ref3 = _reference(x3, w3, eps)
    assert jnp.allclose(out3, ref3, atol=1e-5, rtol=1e-5)

    # Case 4: packed path with a multi-step grid (rows=256 -> 64 packed rows,
    # row_tile=16 -> 4 steps) and a non-trivial fp16 weight (checks weight fold).
    w4 = (0.5 + jnp.arange(hidden, dtype=jnp.float32) / hidden).astype(jnp.float16)
    x4 = jax.random.normal(k4, (4, 64, hidden), dtype=jnp.float32)
    out4 = jax.block_until_ready(mixed_fused_rmsnorm(x4, w4, eps=eps, row_tile=16))
    ref4 = _reference(x4, w4, eps)
    assert jnp.allclose(out4, ref4, atol=1e-5, rtol=1e-5)

    print("KERNEL_OK")
</pallas_src>

<mosaic_0001>
module attributes {stable_mosaic.version = 11 : i64} {
  func.func @_rmsnorm_packed_kernel(%arg0: i32, %arg1: memref<4x128xf32, #tpu.memory_space<vmem>>, %arg2: memref<128x4xf32, #tpu.memory_space<vmem>>, %arg3: memref<4x128xf32, #tpu.memory_space<vmem>>, %arg4: memref<4x128xf32, #tpu.memory_space<vmem>>) attributes {dimension_semantics = [#tpu.dimension_semantics<parallel>], iteration_bounds = array<i64: 1>, scalar_prefetch = 0 : i64, scratch_operands = 0 : i64, tpu.core_type = #tpu.core_type<tc>, window_params = [{transform_indices = @transform_0, window_bounds = array<i64: 4, 128>}, {pipeline_mode = #tpu.pipeline_mode<synchronous>, transform_indices = @transform_1, window_bounds = array<i64: 128, 4>}, {pipeline_mode = #tpu.pipeline_mode<synchronous>, transform_indices = @transform_2, window_bounds = array<i64: 4, 128>}, {transform_indices = @transform_3, window_bounds = array<i64: 4, 128>}]} {
    %c0 = arith.constant 0 : index
    %c0_0 = arith.constant 0 : index
    %0 = vector.load %arg1[%c0, %c0_0] : memref<4x128xf32, #tpu.memory_space<vmem>>, vector<4x128xf32>
    %1 = arith.mulf %0, %0 : vector<4x128xf32>
    %c0_1 = arith.constant 0 : index
    %c0_2 = arith.constant 0 : index
    %2 = vector.load %arg2[%c0_1, %c0_2] : memref<128x4xf32, #tpu.memory_space<vmem>>, vector<128x4xf32>
    %cst = arith.constant dense<0.000000e+00> : vector<4x4xf32>
    %3 = tpu.matmul %1, %2, %cst {dimension_numbers = #tpu.dot_dimension_numbers<[1], [0], [0], [1], [0, 0, 1, 1], [], []>} : vector<4x128xf32>, vector<128x4xf32>, vector<4x4xf32> -> vector<4x4xf32>
    %cst_3 = arith.constant 3.125000e-02 : f32
    %4 = vector.broadcast %cst_3 : f32 to vector<4x4xf32>
    %5 = arith.mulf %3, %4 : vector<4x4xf32>
    %cst_4 = arith.constant 9.99999997E-7 : f32
    %6 = vector.broadcast %cst_4 : f32 to vector<4x4xf32>
    %7 = arith.addf %5, %6 : vector<4x4xf32>
    %8 = math.rsqrt %7 : vector<4x4xf32>
    %c0_5 = arith.constant 0 : index
    %c0_6 = arith.constant 0 : index
    %9 = vector.load %arg3[%c0_5, %c0_6] : memref<4x128xf32, #tpu.memory_space<vmem>>, vector<4x128xf32>
    %cst_7 = arith.constant dense<0.000000e+00> : vector<4x128xf32>
    %10 = tpu.matmul %8, %9, %cst_7 {dimension_numbers = #tpu.dot_dimension_numbers<[1], [0], [0], [1], [0, 0, 1, 1], [], []>} : vector<4x4xf32>, vector<4x128xf32>, vector<4x128xf32> -> vector<4x128xf32>
    %11 = arith.mulf %0, %10 : vector<4x128xf32>
    %c0_8 = arith.constant 0 : index
    %c0_9 = arith.constant 0 : index
    %12 = vector.load %arg4[%c0_8, %c0_9] : memref<4x128xf32, #tpu.memory_space<vmem>>, vector<4x128xf32>
    tpu.vector_store %arg4[%c0_8, %c0_9], %11 {strides = array<i32>} : memref<4x128xf32, #tpu.memory_space<vmem>>, vector<4x128xf32>,
    return
  }
  func.func @transform_0(%arg0: i32) -> (i32, i32) {
    %c0_i32 = arith.constant 0 : i32
    %c0_i32_0 = arith.constant 0 : i32
    return %arg0, %c0_i32 : i32, i32
  }
  func.func @transform_1(%arg0: i32) -> (i32, i32) {
    %c0_i32 = arith.constant 0 : i32
    %c0_i32_0 = arith.constant 0 : i32
    %c0_i32_1 = arith.constant 0 : i32
    return %c0_i32, %c0_i32_0 : i32, i32
  }
  func.func @transform_2(%arg0: i32) -> (i32, i32) {
    %c0_i32 = arith.constant 0 : i32
    %c0_i32_0 = arith.constant 0 : i32
    %c0_i32_1 = arith.constant 0 : i32
    return %c0_i32, %c0_i32_0 : i32, i32
  }
  func.func @transform_3(%arg0: i32) -> (i32, i32) {
    %c0_i32 = arith.constant 0 : i32
    %c0_i32_0 = arith.constant 0 : i32
    return %arg0, %c0_i32 : i32, i32
  }
}

</mosaic_0001>

<bundles_post_ra>
// kernel: tpu_custom_call.1
= control target key start
LH: loop header
LB: loop body
LE: loop exit
PB: predicated region body
PF: predicated region fallthrough
CT: control target
= control target key end

     0   :  { %v316_v3 = vmov 0.0|0.0   ;;  %vm317_vm0 = vmmov 0   ;;  %v318_v6 = vmov 0.0   ;;  %s406_s0 = inlined_call_operand.vmem [shape: f32[4,128], index: 0, kind: input, shape index: {}]   ;;  %s407_s1 = inlined_call_operand.vmem [shape: f32[128,4], index: 1, kind: input, shape index: {}]   ;;  %s408_s2 = inlined_call_operand.vmem [shape: f32[4,128], index: 2, kind: input, shape index: {}]   ;;  %s409_s3 = inlined_call_operand.hbm [shape: f32[4,128], index: 3, kind: output, shape index: {}]  }
   0x1   :  { %v17_v0 = vld [vmem:[%s407_s1] sm:$0xff]  ;;  %v18_v1 = vld [vmem:[%s407_s1 + $0x8] sm:$0xff]  ;;  %v19_v2 = vld [vmem:[%s407_s1 + $0x10] sm:$0xff]  ;;  %262 = vmatprep.subr.bf16.mxu0 %v316_v3  ;;  %254 = vmatprep.mubr.msk.f32.mxu0 %vm317_vm0, %v318_v6 }
   0x2   :  { %v263_v4 = vpack.c.bf16 %v18_v1, %v17_v0  ;;  %v20_v5 = vld [vmem:[%s407_s1 + $0x18] sm:$0xff]  ;;  %257 = vmatprep.subr.mxu1 %v318_v6  ;;  %259 = vmatprep.mubr.msk.f32.mxu1 %vm317_vm0, %v318_v6  ;;  %v21_v8 = vld [vmem:[%s407_s1 + $0x20] sm:$0xff]  ;;  %v22_v9 = vld [vmem:[%s407_s1 + $0x28] sm:$0xff] }
   0x3   :  { %v266_v7 = vpack.c.bf16 %v20_v5, %v19_v2 }
   0x4   :  { %264 = vmatpush3.bf16.msra.mxu0 %v263_v4 }
   0x5   :  { %265 = vmatprep.subr.bf16.mxu0 %v316_v3 }
   0x6   :  { %8 = vsyncpa [#allocation3], 0  ;;  %v269_v10 = vpack.c.bf16 %v22_v9, %v21_v8  ;;  %v23_v11 = vld [vmem:[%s407_s1 + $0x30] sm:$0xff]  ;;  %v24_v12 = vld [vmem:[%s407_s1 + $0x38] sm:$0xff]  ;;  %vm111_vm1 = vcmask 1043456   ;;  %vm107_vm2 = vcmask 31744  }
   0x7   :  { %v272_v13 = vpack.c.bf16 %v24_v12, %v23_v11  ;;  %v25_v14 = vld [vmem:[%s407_s1 + $0x40] sm:$0xff]  ;;  %v26_v15 = vld [vmem:[%s407_s1 + $0x48] sm:$0xff]  ;;  %v27_v17 = vld [vmem:[%s407_s1 + $0x50] sm:$0xff] }
   0x8   :  { %267 = vmatpush3.bf16.msra.mxu0 %v266_v7  ;;  %v275_v16 = vpack.c.bf16 %v26_v15, %v25_v14  ;;  %v28_v18 = vld [vmem:[%s407_s1 + $0x58] sm:$0xff]  ;;  %v29_v20 = vld [vmem:[%s407_s1 + $0x60] sm:$0xff]  ;;  %v30_v21 = vld [vmem:[%s407_s1 + $0x68] sm:$0xff] }
   0x9   :  { %268 = vmatprep.subr.bf16.mxu0 %v316_v3  ;;  %v278_v19 = vpack.c.bf16 %v28_v18, %v27_v17  ;;  %v281_v22 = vpack.c.bf16 %v30_v21, %v29_v20  ;;  %v31_v23 = vld [vmem:[%s407_s1 + $0x70] sm:$0xff]  ;;  %v32_v24 = vld [vmem:[%s407_s1 + $0x78] sm:$0xff]  ;;  %v15_v26 = vld [vmem:[%s406_s0] sm:$0xf]  ;;  %s319_s1 = smov [#allocation2]  }
   0xa   :  { %v284_v25 = vpack.c.bf16 %v32_v24, %v31_v23  ;;  %v16_v27 = vmul.f32 %v15_v26, %v15_v26  ;;  %v106_v28 = vld [vmem:[%s408_s2] sm:$0xf]  ;;  %s193_s0 = sshll.u32 %s319_s1, 4  ;;  %s194_s0 = int_to_ptr.vmem [resolvable:$true] %s193_s0 }
   0xb   :  { %258 = vmatpush3.msk.msra.mxu1 %vm111_vm1, %v106_v28  ;;  %s292_s21 = scalar_lea.vmem %s194_s0, 64  ;;  %p297_p1 = scmp.lt.s32.totalorder %s194_s0, %s194_s0 }
   0xc   :  { %270 = vmatpush3.bf16.msra.mxu0 %v269_v10  ;;  %p293_p0 = scmp.ne.s32.totalorder %s194_s0, %s292_s21  ;;  %p298_p2 = scmp.lt.s32.totalorder %s292_s21, %s292_s21 }
   0xd   :  { %271 = vmatprep.subr.bf16.mxu0 %v316_v3 }
   0xe   :  { %p299_p3 = por %p298_p2, %p297_p1 }
  0x10   :  { %273 = vmatpush3.bf16.msra.mxu0 %v272_v13  ;;  %p300_p4 = pnand %p299_p3, %p293_p0 }
  0x11   :  { %274 = vmatprep.subr.bf16.mxu0 %v316_v3 }
  0x14   :  { %276 = vmatpush3.bf16.msra.mxu0 %v275_v16 }
  0x15   :  { %277 = vmatprep.subr.bf16.mxu0 %v316_v3 }
  0x18   :  { %279 = vmatpush3.bf16.msra.mxu0 %v278_v19 }
  0x19   :  { %280 = vmatprep.subr.bf16.mxu0 %v316_v3 }
  0x1c   :  { %282 = vmatpush3.bf16.msra.mxu0 %v281_v22 }
  0x1d   :  { %283 = vmatprep.subr.bf16.mxu0 %v316_v3 }
  0x20   :  { %285 = vmatpush3.bf16.msra.mxu0 %v284_v25 }
  0x23   :  { %255 = vmatmul.mubr.f32.vlgmr.msra.gmra.mrb[0].mxu0 %v16_v27 }
  0xf6   :  { %v99_v29 = vpop.f32.mrb[0].mxu0 }
  0xf7   :  { %v103_v30 = vmul.f32 0.03125, %v99_v29  ;;  %v256_v31 = vpop.f32.mrb[1].mxu0 }
  0xf9   :  { %v104_v32 = vadd.f32 1e-06, %v103_v30 }
  0xfb   :  { %290 = vrsqrt.f32 %v104_v32 }
 0x105   :  { %v291_v33 = vpop.eup %290 }
 0x106   :  { %260 = vmatmul.mubr.msk.f32.vlgmr.msra.gmra.mrb[0].mxu1 %vm107_vm2, %v291_v33 }
 0x1d9   :  { %v181_v34 = vpop.f32.mrb[0].mxu1 }
 0x1da   :  { %v185_v35 = vmul.f32 %v181_v34, %v15_v26  ;;  %v261_v36 = vpop.f32.mrb[1].mxu1 }
 0x1dc   :  { %186 = vst [vmem:[#allocation2] sm:$0xf] %v185_v35 }
 0x1dd   :  { %303 = shalt.err (!%p300_p4)
}
 0x1de   :  { %s304_s23 = scalar_lea.hbm %s409_s3, 64 }
 0x1df   :  { %p305_p5 = scmp.ne.s32.totalorder %s409_s3, %s304_s23  ;;  %p308_p6 = scmp.lt.u32.totalorder %s304_s23, %s409_s3 }
 0x1e1   :  { %p310_p7 = pnand %p308_p6, %p305_p5 }
 0x1e3   :  { %313 = shalt.err (!%p310_p7)
}
 0x1e4   :  { %196 = dma.vmem_to_hbm [thread:$0]  %s194_s0, 64, %s409_s3, [#allocation3]  }
 0x1e5   :  { %314 = dma.done.wait [#allocation3], 64  }
 0x1e6   :  { %315 = vsyncadd [#allocation3], 4294967232 }
 0x1e7   :  { %200 = vsyncpa [#allocation3], 1 }

</bundles_post_ra>
